<compile_context>
chip_gen: v6e
topology: v6e:2x2x1
jax: 0.10.0
libtpu: 0.0.40
codegen_flags: <defaults>
</compile_context>

<pallas_src>
import jax
import jax.numpy as jnp
from jax import lax
from jax.experimental import pallas as pl
from jax.experimental.pallas import tpu as pltpu


def _mean_pool_kernel(h_ref, m_ref, o_ref, acc_ref, cnt_ref):
    # h_ref  : (TB, TS, H)  hidden states (native dtype)
    # m_ref  : (TB, 1, TS)  attention mask, lane-dense along S
    # o_ref  : (TB, 1, H)   output block (written once, at the last S-tile)
    # acc_ref: (TB, 1, H) f32 scratch -- running masked sum
    # cnt_ref: (TB, 1, 1) f32 scratch -- running valid-token count
    s_idx = pl.program_id(1)

    @pl.when(s_idx == 0)
    def _init():
        acc_ref[...] = jnp.zeros_like(acc_ref)
        cnt_ref[...] = jnp.zeros_like(cnt_ref)

    h = h_ref[...]                                    # (TB, TS, H)
    m_f32 = m_ref[...].astype(jnp.float32)            # (TB, 1, TS)

    # Masked sum over this sequence tile, fused on the MXU (f32 accumulation):
    #   (TB, 1, TS) @ (TB, TS, H) -> (TB, 1, H).  HIGHEST precision keeps f32
    # inputs exact (kernel is HBM-bound, extra MXU passes are hidden).
    acc_ref[...] += jnp.einsum(
        "bqs,bsh->bqh",
        m_f32.astype(h.dtype),
        h,
        preferred_element_type=jnp.float32,
        precision=lax.Precision.HIGHEST,
    )
    cnt_ref[...] += jnp.sum(m_f32, axis=2, keepdims=True)   # (TB, 1, 1)

    @pl.when(s_idx == pl.num_programs(1) - 1)
    def _finalize():
        denom = jnp.maximum(cnt_ref[...], 1e-9)       # torch.clamp(min=1e-9)
        o_ref[...] = (acc_ref[...] / denom).astype(o_ref.dtype)


def _choose_tiles(B, S, H, itemsize, max_tile_bytes):
    # Sequence tile: full S if it fits the budget, otherwise the largest
    # divisor of S that is a multiple of 128 (keeps the lane-dense mask block
    # and the h second-minor dim tile-aligned) and fits. Falls back to full S.
    if S * H * itemsize <= max_tile_bytes:
        ts = S
    else:
        ts = S
        for cand in range(128, S, 128):
            if S % cand == 0 and cand * H * itemsize <= max_tile_bytes:
                ts = cand
    # Batch packing: amortize per-grid-step overhead at small shapes.
    tb = 1
    for cand in (8, 4, 2):
        if B % cand == 0 and cand * ts * H * itemsize <= max_tile_bytes:
            tb = cand
            break
    return tb, ts


def mean_pooling(last_hidden_state: jax.Array,
                 attention_mask: jax.Array,
                 *, max_tile_bytes: int = 4 * 1024 * 1024) -> jax.Array:
    """Masked mean pooling over the sequence axis.

    last_hidden_state: [B, S, H] float
    attention_mask:    [B, S]    (numeric / bool)
    returns:           [B, H]    float32 (matches torch promotion: x * mask.float())
    """
    B, S, H = last_hidden_state.shape
    if attention_mask.dtype == jnp.bool_:
        attention_mask = attention_mask.astype(jnp.int32)
    mask = attention_mask.reshape(B, 1, S)            # lane-dense: S on lanes

    itemsize = jnp.dtype(last_hidden_state.dtype).itemsize
    TB, TS = _choose_tiles(B, S, H, itemsize, max_tile_bytes)
    grid = (B // TB, S // TS)

    out = pl.pallas_call(
        _mean_pool_kernel,
        out_shape=jax.ShapeDtypeStruct((B, 1, H), jnp.float32),
        grid_spec=pltpu.PrefetchScalarGridSpec(
            num_scalar_prefetch=0,
            grid=grid,
            in_specs=[
                pl.BlockSpec((TB, TS, H), lambda b, s: (b, s, 0)),
                pl.BlockSpec((TB, 1, TS), lambda b, s: (b, 0, s)),
            ],
            out_specs=pl.BlockSpec((TB, 1, H), lambda b, s: (b, 0, 0)),
            scratch_shapes=[
                pltpu.VMEM((TB, 1, H), jnp.float32),   # running masked sum
                pltpu.VMEM((TB, 1, 1), jnp.float32),   # running token count
            ],
        ),
        compiler_params=pltpu.CompilerParams(
            dimension_semantics=("parallel", "arbitrary"),
            vmem_limit_bytes=32 * 1024 * 1024,
        ),
    )(last_hidden_state, mask)

    return out.reshape(B, H)


def _reference(last_hidden_state, attention_mask):
    m = attention_mask.astype(jnp.float32)[..., None]
    s = jnp.sum(last_hidden_state.astype(jnp.float32) * m, axis=1)
    d = jnp.maximum(jnp.sum(m, axis=1), 1e-9)
    return s / d


if __name__ == "__main__":
    key = jax.random.PRNGKey(0)
    k1, k2, k3, k4 = jax.random.split(key, 4)

    # Shapes implied by the module: [batch, seq, hidden] + [batch, seq] mask.
    B, S, H = 2, 8, 32
    hidden = jax.random.normal(k1, (B, S, H), dtype=jnp.float32)
    amask = (jax.random.uniform(k2, (B, S)) > 0.3).astype(jnp.int32)

    out = mean_pooling(hidden, amask)
    jax.block_until_ready(out)
    ref = _reference(hidden, amask)
    assert out.shape == (B, H), out.shape
    assert jnp.allclose(out, ref, atol=1e-5, rtol=1e-5), "mismatch vs reference (small)"

    # Also exercise the tiled, accumulating path (multiple S-tiles per row).
    B2, S2, H2 = 4, 256, 256
    hidden2 = jax.random.normal(k3, (B2, S2, H2), dtype=jnp.float32)
    amask2 = (jax.random.uniform(k4, (B2, S2)) > 0.5).astype(jnp.int32)
    out2 = mean_pooling(hidden2, amask2, max_tile_bytes=128 * 1024)  # forces TS=128
    jax.block_until_ready(out2)
    ref2 = _reference(hidden2, amask2)
    assert jnp.allclose(out2, ref2, atol=1e-4, rtol=1e-4), "mismatch vs reference (tiled)"

    print("KERNEL_OK")
</pallas_src>

<mosaic_0001>
module attributes {stable_mosaic.version = 11 : i64} {
  func.func @_mean_pool_kernel(%arg0: i32, %arg1: i32, %arg2: memref<2x8x32xf32, #tpu.memory_space<vmem>>, %arg3: memref<2x1x8xi32, #tpu.memory_space<vmem>>, %arg4: memref<2x1x32xf32, #tpu.memory_space<vmem>>, %arg5: memref<2x1x32xf32, #tpu.memory_space<vmem>>, %arg6: memref<2x1x1xf32, #tpu.memory_space<vmem>>) attributes {dimension_semantics = [#tpu.dimension_semantics<parallel>, #tpu.dimension_semantics<arbitrary>], iteration_bounds = array<i64: 1, 1>, scalar_prefetch = 0 : i64, scratch_operands = 2 : i64, tpu.core_type = #tpu.core_type<tc>, window_params = [{transform_indices = @transform_0, window_bounds = array<i64: 2, 8, 32>}, {transform_indices = @transform_1, window_bounds = array<i64: 2, 1, 8>}, {transform_indices = @transform_2, window_bounds = array<i64: 2, 1, 32>}]} {
    %c0_i32 = arith.constant 0 : i32
    %0 = arith.cmpi eq, %arg1, %c0_i32 : i32
    %1 = arith.extui %0 : i1 to i32
    %c0_i32_0 = arith.constant 0 : i32
    %2 = arith.cmpi ne, %1, %c0_i32_0 : i32
    scf.if %2 {
      %cst_21 = arith.constant 0.000000e+00 : f32
      %18 = vector.broadcast %cst_21 : f32 to vector<2x1x32xf32>
      %c0_22 = arith.constant 0 : index
      %c0_23 = arith.constant 0 : index
      %c0_24 = arith.constant 0 : index
      %19 = vector.load %arg5[%c0_22, %c0_23, %c0_24] : memref<2x1x32xf32, #tpu.memory_space<vmem>>, vector<2x1x32xf32>
      tpu.vector_store %arg5[%c0_22, %c0_23, %c0_24], %18 {strides = array<i32>} : memref<2x1x32xf32, #tpu.memory_space<vmem>>, vector<2x1x32xf32>,
      %cst_25 = arith.constant 0.000000e+00 : f32
      %20 = vector.broadcast %cst_25 : f32 to vector<2x1x1xf32>
      %c0_26 = arith.constant 0 : index
      %c0_27 = arith.constant 0 : index
      %c0_28 = arith.constant 0 : index
      %21 = vector.load %arg6[%c0_26, %c0_27, %c0_28] : memref<2x1x1xf32, #tpu.memory_space<vmem>>, vector<2x1x1xf32>
      tpu.vector_store %arg6[%c0_26, %c0_27, %c0_28], %20 {strides = array<i32>} : memref<2x1x1xf32, #tpu.memory_space<vmem>>, vector<2x1x1xf32>,
    } else {
    }
    %c0 = arith.constant 0 : index
    %c0_1 = arith.constant 0 : index
    %c0_2 = arith.constant 0 : index
    %3 = vector.load %arg2[%c0, %c0_1, %c0_2] : memref<2x8x32xf32, #tpu.memory_space<vmem>>, vector<2x8x32xf32>
    %c0_3 = arith.constant 0 : index
    %c0_4 = arith.constant 0 : index
    %c0_5 = arith.constant 0 : index
    %4 = vector.load %arg3[%c0_3, %c0_4, %c0_5] : memref<2x1x8xi32, #tpu.memory_space<vmem>>, vector<2x1x8xi32>
    %5 = arith.sitofp %4 : vector<2x1x8xi32> to vector<2x1x8xf32>
    %c0_6 = arith.constant 0 : index
    %c0_7 = arith.constant 0 : index
    %c0_8 = arith.constant 0 : index
    %6 = vector.load %arg5[%c0_6, %c0_7, %c0_8] : memref<2x1x32xf32, #tpu.memory_space<vmem>>, vector<2x1x32xf32>
    "tpu.trace_start"() <{level = 10 : i32, message = "bqs,bsh->bqh"}> : () -> ()
    %cst = arith.constant dense<0.000000e+00> : vector<2x1x32xf32>
    %7 = tpu.matmul %5, %3, %cst {dimension_numbers = #tpu.dot_dimension_numbers<[2], [1], [1], [2], [0, 0, 0, 1, 1, 2], [0], [0]>, precision = #tpu.contract_precision<fp32>} : vector<2x1x8xf32>, vector<2x8x32xf32>, vector<2x1x32xf32> -> vector<2x1x32xf32>
    "tpu.trace_stop"() : () -> ()
    %8 = arith.addf %6, %7 : vector<2x1x32xf32>
    %c0_9 = arith.constant 0 : index
    %c0_10 = arith.constant 0 : index
    %c0_11 = arith.constant 0 : index
    %9 = vector.load %arg5[%c0_9, %c0_10, %c0_11] : memref<2x1x32xf32, #tpu.memory_space<vmem>>, vector<2x1x32xf32>
    tpu.vector_store %arg5[%c0_9, %c0_10, %c0_11], %8 {strides = array<i32>} : memref<2x1x32xf32, #tpu.memory_space<vmem>>, vector<2x1x32xf32>,
    %c0_12 = arith.constant 0 : index
    %c0_13 = arith.constant 0 : index
    %c0_14 = arith.constant 0 : index
    %10 = vector.load %arg6[%c0_12, %c0_13, %c0_14] : memref<2x1x1xf32, #tpu.memory_space<vmem>>, vector<2x1x1xf32>
    %cst_15 = arith.constant dense<0.000000e+00> : vector<2x1xf32>
    %11 = vector.multi_reduction <add>, %5, %cst_15 [2] : vector<2x1x8xf32> to vector<2x1xf32>
    %12 = vector.shape_cast %11 : vector<2x1xf32> to vector<2x1x1xf32>
    %13 = arith.addf %10, %12 : vector<2x1x1xf32>
    %c0_16 = arith.constant 0 : index
    %c0_17 = arith.constant 0 : index
    %c0_18 = arith.constant 0 : index
    %14 = vector.load %arg6[%c0_16, %c0_17, %c0_18] : memref<2x1x1xf32, #tpu.memory_space<vmem>>, vector<2x1x1xf32>
    tpu.vector_store %arg6[%c0_16, %c0_17, %c0_18], %13 {strides = array<i32>} : memref<2x1x1xf32, #tpu.memory_space<vmem>>, vector<2x1x1xf32>,
    %c0_i32_19 = arith.constant 0 : i32
    %15 = arith.cmpi eq, %arg1, %c0_i32_19 : i32
    %16 = arith.extui %15 : i1 to i32
    %c0_i32_20 = arith.constant 0 : i32
    %17 = arith.cmpi ne, %16, %c0_i32_20 : i32
    scf.if %17 {
      %c0_21 = arith.constant 0 : index
      %c0_22 = arith.constant 0 : index
      %c0_23 = arith.constant 0 : index
      %18 = vector.load %arg6[%c0_21, %c0_22, %c0_23] : memref<2x1x1xf32, #tpu.memory_space<vmem>>, vector<2x1x1xf32>
      %cst_24 = arith.constant 9.99999971E-10 : f32
      %19 = vector.broadcast %cst_24 : f32 to vector<2x1x1xf32>
      %20 = arith.maximumf %18, %19 : vector<2x1x1xf32>
      %c0_25 = arith.constant 0 : index
      %c0_26 = arith.constant 0 : index
      %c0_27 = arith.constant 0 : index
      %21 = vector.load %arg5[%c0_25, %c0_26, %c0_27] : memref<2x1x32xf32, #tpu.memory_space<vmem>>, vector<2x1x32xf32>
      %22 = vector.broadcast %20 : vector<2x1x1xf32> to vector<2x1x32xf32>
      %23 = arith.divf %21, %22 : vector<2x1x32xf32>
      %c0_28 = arith.constant 0 : index
      %c0_29 = arith.constant 0 : index
      %c0_30 = arith.constant 0 : index
      %24 = vector.load %arg4[%c0_28, %c0_29, %c0_30] : memref<2x1x32xf32, #tpu.memory_space<vmem>>, vector<2x1x32xf32>
      tpu.vector_store %arg4[%c0_28, %c0_29, %c0_30], %23 {strides = array<i32>} : memref<2x1x32xf32, #tpu.memory_space<vmem>>, vector<2x1x32xf32>,
    } else {
    }
    return
  }
  func.func @transform_0(%arg0: i32, %arg1: i32) -> (i32, i32, i32) {
    %c0_i32 = arith.constant 0 : i32
    %c0_i32_0 = arith.constant 0 : i32
    return %arg0, %arg1, %c0_i32 : i32, i32, i32
  }
  func.func @transform_1(%arg0: i32, %arg1: i32) -> (i32, i32, i32) {
    %c0_i32 = arith.constant 0 : i32
    %c0_i32_0 = arith.constant 0 : i32
    return %arg0, %c0_i32, %arg1 : i32, i32, i32
  }
  func.func @transform_2(%arg0: i32, %arg1: i32) -> (i32, i32, i32) {
    %c0_i32 = arith.constant 0 : i32
    %c0_i32_0 = arith.constant 0 : i32
    %c0_i32_1 = arith.constant 0 : i32
    return %arg0, %c0_i32, %c0_i32_0 : i32, i32, i32
  }
}

</mosaic_0001>

<bundles_post_ra>
// kernel: tpu_custom_call.1
= control target key start
LH: loop header
LB: loop body
LE: loop exit
PB: predicated region body
PF: predicated region fallthrough
CT: control target
= control target key end

     0   :  { %7 = vsyncpa [#allocation5], 0  ;;  %s1285_s0 = inlined_call_operand.hbm [shape: f32[2,8,32], index: 0, kind: input, shape index: {}]   ;;  %s1286_s1 = inlined_call_operand.hbm [shape: s32[2,1,8], index: 1, kind: input, shape index: {}]   ;;  %s1287_s2 = inlined_call_operand.hbm [shape: f32[2,1,32], index: 2, kind: output, shape index: {}]  }
   0x1   :  { %8 = vsyncpa [#allocation8], 0 }
   0x2   :  { %9 = vsyncpa [#allocation6], 0  ;;  %s1193_s9 = smov [#allocation4]  }
   0x3   :  { %s15_s10 = sshll.u32 %s1193_s9, 4  ;;  %s16_s10 = int_to_ptr.vmem [resolvable:$true] %s15_s10 }
   0x4   :  { %s1135_s11 = scalar_lea.vmem %s16_s10, 256  ;;  %p1140_p1 = scmp.lt.s32.totalorder %s16_s10, %s16_s10 }
   0x5   :  { %p1136_p0 = scmp.ne.s32.totalorder %s16_s10, %s1135_s11  ;;  %p1141_p2 = scmp.lt.s32.totalorder %s1135_s11, %s1135_s11 }
   0x7   :  { %p1142_p3 = por %p1141_p2, %p1140_p1 }
   0x9   :  { %p1143_p4 = pnand %p1142_p3, %p1136_p0 }
   0xb   :  { %1146 = shalt.err (!%p1143_p4)
}
   0xc   :  { %s1194_s12 = smov 128   ;;  %s1195_s13 = smov 8  }
   0xd   :  { %21 = dma.hbm_to_vmem [thread:$0]  %s1285_s0, 256, %s16_s10, [#allocation5], %s1194_s12, %s1194_s12, %s1195_s13  }
   0xe   :  { %s1196_s16 = smov [#allocation7]  }
   0xf   :  { %s27_s17 = sshll.u32 %s1196_s16, 4  ;;  %s28_s17 = int_to_ptr.vmem [resolvable:$true] %s27_s17 }
  0x10   :  { %s1155_s18 = scalar_lea.vmem %s28_s17, 32  ;;  %p1160_p6 = scmp.lt.s32.totalorder %s28_s17, %s28_s17 }
  0x11   :  { %p1156_p5 = scmp.ne.s32.totalorder %s28_s17, %s1155_s18  ;;  %p1161_p7 = scmp.lt.s32.totalorder %s1155_s18, %s1155_s18 }
  0x13   :  { %p1162_p8 = por %p1161_p7, %p1160_p6 }
  0x15   :  { %p1163_p9 = pnand %p1162_p8, %p1156_p5 }
  0x17   :  { %1166 = shalt.err (!%p1163_p9)
}
  0x18   :  { %s1197_s19 = smov 16   ;;  %s1198_s20 = smov 1  }
  0x19   :  { %33 = dma.hbm_to_vmem [thread:$0]  %s1286_s1, 32, %s28_s17, [#allocation8], %s1197_s19, %s1197_s19, %s1198_s20  }
  0x1a   :  { %1187 = dma.done.wait [#allocation5], 256  }
  0x1b   :  { %1188 = vsyncadd [#allocation5], 4294967040 }
  0x1c   :  { %1189 = dma.done.wait [#allocation8], 32  }
  0x1d   :  { %1190 = vsyncadd [#allocation8], 4294967264  ;;  %v1199_v0 = vmov 0.0   ;;  %vm1200_vm0 = vmmov 0   ;;  %vm47_vm1 = vcmask 0   ;;  %vm58_vm2 = vcmask 64512  }
  0x1e   :  { %1051 = vmatprep.subr.mxu0 %v1199_v0  ;;  %1053 = vmatprep.mubr.msk.f32.mxu0 %vm1200_vm0, %v1199_v0  ;;  %48 = vst.msk [vmem:[#allocation3] sm:$0x1] %vm47_vm1, %v1199_v0  ;;  %49 = vst.msk [vmem:[#allocation3 + $0x1] sm:$0x1] %vm47_vm1, %v1199_v0  ;;  %v52_v1 = vld [vmem:[#allocation7] sm:$0x1] }
  0x1f   :  { %1056 = vmatprep.subr.mxu1 %v1199_v0  ;;  %1058 = vmatprep.mubr.msk.f32.mxu1 %vm1200_vm0, %v1199_v0  ;;  %vm964_vm3 = vcmask 57344   ;;  %v53_v2 = vld [vmem:[#allocation7 + $0x1] sm:$0x1]  ;;  %v50_v3 = vld [vmem:[#allocation4] sm:$0xff]  ;;  %v54_v4 = vcvt.s32.f32 %v52_v1  ;;  %v51_v7 = vld [vmem:[#allocation4 + $0x8] sm:$0xff]  ;;  %v1201_v31 = vmov 0  }
  0x20   :  { %v55_v5 = vcvt.s32.f32 %v53_v2  ;;  %v93_v6 = vand.u32 4294901760, %v50_v3  ;;  %v542_v8 = vand.u32 4294901760, %v51_v7  ;;  %1121 = vset.pattern.permute.xlu1 %v1201_v31  ;;  %1122 = vset.pattern.permute.xlu0 %v1201_v31  ;;  %vm44_vm4 = vcmask 253952   ;;  %s1202_s0 = smov [#allocation9]  }
  0x21   :  { %v965_v9 = vsel %vm964_vm3, %v54_v4, 0.0  ;;  %v60_v10 = vsel %vm58_vm2, %v54_v4, 0  ;;  %45 = vst.msk [vmem:[#allocation2] sm:$0x1] %vm44_vm4, %v1199_v0  ;;  %46 = vst.msk [vmem:[#allocation2 + $0x1] sm:$0x1] %vm44_vm4, %v1199_v0 }
  0x22   :  { %v509_v11 = vsel %vm58_vm2, %v55_v5, 0  ;;  %1052 = vmatpush3.msra.mxu0 %v93_v6  ;;  %966 = vadd.xlane.f32.xlu0 %v965_v9  ;;  %v128_v12 = vand.u32 4294901760, %v60_v10  ;;  %v170_v13 = vsub.f32 %v50_v3, %v93_v6  ;;  %v968_v14 = vsel %vm964_vm3, %v55_v5, 0.0  ;;  %s1014_s1 = sshll.u32 %s1202_s0, 4  ;;  %s1015_s1 = int_to_ptr.vmem [resolvable:$true] %s1014_s1 }
  0x23   :  { %1061 = vmatprep.subr.mxu0 %v1199_v0  ;;  %v577_v16 = vand.u32 4294901760, %v509_v11  ;;  %v619_v18 = vsub.f32 %v51_v7, %v542_v8  ;;  %s1167_s23 = scalar_lea.vmem %s1015_s1, 32  ;;  %p1172_p11 = scmp.lt.s32.totalorder %s1015_s1, %s1015_s1 }
  0x24   :  { %v129_v15 = vsub.f32 %v60_v10, %v128_v12  ;;  %v171_v17 = vand.u32 4294901760, %v170_v13  ;;  %p1168_p10 = scmp.ne.s32.totalorder %s1015_s1, %s1167_s23  ;;  %p1173_p12 = scmp.lt.s32.totalorder %s1167_s23, %s1167_s23 }
  0x25   :  { %v578_v21 = vsub.f32 %v509_v11, %v577_v16  ;;  %v620_v24 = vand.u32 4294901760, %v619_v18  ;;  %v962_v32 = vld [vmem:[#allocation3] sm:$0x1]  ;;  %v963_v35 = vld [vmem:[#allocation3 + $0x1] sm:$0x1] }
  0x26   :  { %969 = vadd.xlane.f32.xlu0 %v968_v14  ;;  %v130_v19 = vand.u32 4294901760, %v129_v15  ;;  %v172_v20 = vsub.f32 %v170_v13, %v171_v17  ;;  %p1174_p13 = por %p1173_p12, %p1172_p11 }
  0x27   :  { %v579_v26 = vand.u32 4294901760, %v578_v21  ;;  %v621_v27 = vsub.f32 %v619_v18, %v620_v24 }
  0x28   :  { %v131_v22 = vsub.f32 %v129_v15, %v130_v19  ;;  %v173_v23 = vand.u32 4294901760, %v172_v20  ;;  %v56_v58 = vld [vmem:[#allocation2] sm:$0x1]  ;;  %p1175_p0 = pnand %p1174_p13, %p1168_p10 }
  0x29   :  { %v580_v28 = vsub.f32 %v578_v21, %v579_v26  ;;  %v622_v29 = vand.u32 4294901760, %v621_v27 }
  0x2a   :  { %v132_v25 = vand.u32 4294901760, %v131_v22  ;;  %1057 = vmatpush3.msra.mxu1 %v173_v23 }
  0x2b   :  { %1059 = vmatmul.mubr.f32.vlgmr.msra.gmra.mxu1 %v128_v12  ;;  %1066 = vmatprep.subr.mxu1 %v1199_v0  ;;  %v581_v30 = vand.u32 4294901760, %v580_v28 }
  0x2c   :  { %1054 = vmatmul.mubr.f32.vlgmr.msra.gmra.mxu0 %v132_v25  ;;  %1067 = vmatpush3.msra.mxu1 %v93_v6 }
  0x2d   :  { %1062 = vmatpush3.msra.mxu0 %v170_v13  ;;  %1063 = vmatprep.mubr.msk.f32.mxu0 %vm1200_vm0, %v1199_v0  ;;  %v57_v13 = vld [vmem:[#allocation2 + $0x1] sm:$0x1] }
  0x2e   :  { %1068 = vmatprep.mubr.msk.f32.mxu1 %vm1200_vm0, %v1199_v0  ;;  %1071 = vmatprep.subr.mxu0 %v1199_v0 }
  0x2f   :  { %1069 = vmatmul.mubr.f32.vlgmr.msra.gmra.mxu1 %v130_v19  ;;  %1076 = vmatprep.subr.mxu1 %v1199_v0 }
  0x30   :  { %1064 = vmatmul.mubr.f32.vlgmr.msra.gmra.mxu0 %v129_v15  ;;  %1077 = vmatpush3.msra.mxu1 %v93_v6 }
  0x31   :  { %1072 = vmatpush3.msra.mxu0 %v171_v17  ;;  %1073 = vmatprep.mubr.msk.f32.mxu0 %vm1200_vm0, %v1199_v0 }
  0x32   :  { %1078 = vmatprep.mubr.msk.f32.mxu1 %vm1200_vm0, %v1199_v0  ;;  %1081 = vmatprep.subr.mxu0 %v1199_v0 }
  0x33   :  { %1079 = vmatmul.mubr.f32.vlgmr.msra.gmra.mxu1 %v128_v12  ;;  %1086 = vmatprep.subr.mxu1 %v1199_v0 }
  0x34   :  { %1074 = vmatmul.mubr.f32.vlgmr.msra.gmra.mxu0 %v128_v12  ;;  %1087 = vmatpush3.msra.mxu1 %v622_v29 }
  0x35   :  { %1082 = vmatpush3.msra.mxu0 %v542_v8  ;;  %1083 = vmatprep.mubr.msk.f32.mxu0 %vm1200_vm0, %v1199_v0 }
  0x36   :  { %1088 = vmatprep.mubr.msk.f32.mxu1 %vm1200_vm0, %v1199_v0  ;;  %1091 = vmatprep.subr.mxu0 %v1199_v0 }
  0x37   :  { %1089 = vmatmul.mubr.f32.vlgmr.msra.gmra.mxu1 %v577_v16  ;;  %1096 = vmatprep.subr.mxu1 %v1199_v0 }
  0x38   :  { %1084 = vmatmul.mubr.f32.vlgmr.msra.gmra.mxu0 %v581_v30  ;;  %1097 = vmatpush3.msra.mxu1 %v542_v8 }
  0x39   :  { %1092 = vmatpush3.msra.mxu0 %v619_v18  ;;  %1093 = vmatprep.mubr.msk.f32.mxu0 %vm1200_vm0, %v1199_v0 }
  0x3a   :  { %1098 = vmatprep.mubr.msk.f32.mxu1 %vm1200_vm0, %v1199_v0  ;;  %1101 = vmatprep.subr.mxu0 %v1199_v0 }
  0x3b   :  { %1099 = vmatmul.mubr.f32.vlgmr.msra.gmra.mxu1 %v579_v26  ;;  %1106 = vmatprep.subr.mxu1 %v1199_v0 }
  0x3c   :  { %1094 = vmatmul.mubr.f32.vlgmr.msra.gmra.mxu0 %v578_v21  ;;  %1107 = vmatpush3.msra.mxu1 %v542_v8 }
  0x3d   :  { %1102 = vmatpush3.msra.mxu0 %v620_v24  ;;  %1103 = vmatprep.mubr.msk.f32.mxu0 %vm1200_vm0, %v1199_v0 }
  0x3e   :  { %1108 = vmatprep.mubr.msk.f32.mxu1 %vm1200_vm0, %v1199_v0 }
  0x3f   :  { %1109 = vmatmul.mubr.f32.vlgmr.msra.gmra.mxu1 %v577_v16 }
  0x40   :  { %1104 = vmatmul.mubr.f32.vlgmr.msra.gmra.mxu0 %v577_v16  ;;  %v990_v16 = vlaneseq }
  0x42   :  { %v991_v17 = vshrl.u32 %v990_v16, 7 }
  0x44   :  { %v992_v18 = vsub.s32 0, %v991_v17 }
  0xab   :  { %v967_v33 = vpop.xlane.xlu0 %966 }
  0xac   :  { %v971_v34 = vadd.f32 %v967_v33, %v962_v32 }
  0xae   :  { %974 = vst.msk [vmem:[#allocation3] sm:$0x1] %vm47_vm1, %v971_v34 }
  0xaf   :  { %v970_v36 = vpop.xlane.xlu0 %969 }
  0xb0   :  { %v972_v37 = vadd.f32 %v970_v36, %v963_v35 }
  0xb2   :  { %975 = vst.msk [vmem:[#allocation3 + $0x1] sm:$0x1] %vm47_vm1, %v972_v37 }
  0xb5   :  { %v979_v38 = vld [vmem:[#allocation3] sm:$0x1] }
  0xb6   :  { %v981_v39 = vmax.f32 %v979_v38, 1e-09 }
  0xb8   :  { %987 = vperm.xlu1 %1121, %v981_v39  }
  0xb9   :  { %v980_v40 = vld [vmem:[#allocation3 + $0x1] sm:$0x1] }
  0xba   :  { %v982_v41 = vmax.f32 %v980_v40, 1e-09 }
  0xbc   :  { %996 = vperm.xlu1 %1121, %v982_v41  }
  0xeb   :  { %v210_v42 = vpop.f32.mrf.mxu1 }
  0xec   :  { %v134_v43 = vpop.f32.mrf.mxu0 }
  0xed   :  { %v211_v44 = vadd.f32 %v210_v42, %v134_v43  ;;  %v1060_v45 = vpop.f32.mrf.mxu1 }
  0xee   :  { %v1055_v46 = vpop.f32.mrf.mxu0 }
  0xef   :  { %v358_v47 = vpop.f32.mrf.mxu1 }
  0xf0   :  { %v284_v48 = vpop.f32.mrf.mxu0 }
  0xf1   :  { %v285_v49 = vadd.f32 %v284_v48, %v211_v44  ;;  %v1070_v50 = vpop.f32.mrf.mxu1 }
  0xf2   :  { %v1065_v51 = vpop.f32.mrf.mxu0 }
  0xf3   :  { %v359_v52 = vadd.f32 %v358_v47, %v285_v49  ;;  %v504_v53 = vpop.f32.mrf.mxu1 }
  0xf4   :  { %v432_v54 = vpop.f32.mrf.mxu0 }
  0xf5   :  { %v433_v55 = vadd.f32 %v432_v54, %v359_v52  ;;  %v1080_v56 = vpop.f32.mrf.mxu1 }
  0xf6   :  { %v1075_v57 = vpop.f32.mrf.mxu0 }
  0xf7   :  { %v505_v59 = vadd.f32 %v504_v53, %v433_v55  ;;  %v659_v60 = vpop.f32.mrf.mxu1 }
  0xf8   :  { %v583_v61 = vpop.f32.mrf.mxu0 }
  0xf9   :  { %v957_v62 = vadd.f32 %v505_v59, %v56_v58  ;;  %v660_v63 = vadd.f32 %v659_v60, %v583_v61  ;;  %v1090_v0 = vpop.f32.mrf.mxu1 }
  0xfa   :  { %v1085_v1 = vpop.f32.mrf.mxu0 }
  0xfb   :  { %960 = vst.msk [vmem:[#allocation2] sm:$0x1] %vm44_vm4, %v957_v62  ;;  %v807_v2 = vpop.f32.mrf.mxu1 }
  0xfc   :  { %v733_v3 = vpop.f32.mrf.mxu0 }
  0xfd   :  { %v734_v4 = vadd.f32 %v733_v3, %v660_v63  ;;  %v1100_v5 = vpop.f32.mrf.mxu1 }
  0xfe   :  { %v1095_v6 = vpop.f32.mrf.mxu0 }
  0xff   :  { %v808_v7 = vadd.f32 %v807_v2, %v734_v4  ;;  %v953_v8 = vpop.f32.mrf.mxu1 }
 0x100   :  { %v881_v9 = vpop.f32.mrf.mxu0 }
 0x101   :  { %v882_v10 = vadd.f32 %v881_v9, %v808_v7  ;;  %v1110_v11 = vpop.f32.mrf.mxu1 }
 0x102   :  { %v1105_v12 = vpop.f32.mrf.mxu0  ;;  %v983_v24 = vld [vmem:[#allocation2] sm:$0x1] }
 0x103   :  { %v954_v14 = vadd.f32 %v953_v8, %v882_v10 }
 0x105   :  { %v958_v15 = vadd.f32 %v954_v14, %v57_v13 }
 0x107   :  { %961 = vst.msk [vmem:[#allocation2 + $0x1] sm:$0x1] %vm44_vm4, %v958_v15 }
 0x10e   :  { %v984_v27 = vld [vmem:[#allocation2 + $0x1] sm:$0x1] }
 0x133   :  { %v988_v19 = vpop.permute.xlu1 %987 }
 0x134   :  { %v993_v20 = vrot.slane %v988_v19, %v992_v18 }
 0x136   :  { %1123 = vrcp.f32 %v993_v20 }
 0x137   :  { %v997_v21 = vpop.permute.xlu1 %996 }
 0x138   :  { %v1002_v22 = vrot.slane %v997_v21, %v992_v18 }
 0x13a   :  { %1125 = vrcp.f32 %v1002_v22 }
 0x143   :  { %v1124_v23 = vpop.eup %1123 }
 0x144   :  { %v1004_v25 = vmul.f32 %v1124_v23, %v983_v24 }
 0x146   :  { %1007 = vst.msk [vmem:[#allocation9] sm:$0x1] %vm44_vm4, %v1004_v25 }
 0x147   :  { %v1126_v26 = vpop.eup %1125 }
 0x148   :  { %v1006_v28 = vmul.f32 %v1126_v26, %v984_v27 }
 0x14a   :  { %1008 = vst.msk [vmem:[#allocation9 + $0x1] sm:$0x1] %vm44_vm4, %v1006_v28 }
 0x14b   :  { %1178 = shalt.err (!%p1175_p0)
}
 0x14c   :  { %1020 = dma.vmem_to_hbm [thread:$0]  %s1015_s1, 32, %s1287_s2, [#allocation6], %s1197_s19, %s1197_s19, %s1198_s20  }
 0x14d   :  { %1191 = dma.done.wait [#allocation6], 32  }
 0x14e   :  { %1192 = vsyncadd [#allocation6], 4294967264 }
 0x14f   :  { %1024 = vsyncpa [#allocation5], 1 }
 0x150   :  { %1025 = vsyncpa [#allocation8], 1 }
 0x151   :  { %1026 = vsyncpa [#allocation6], 1 }

</bundles_post_ra>
